<compile_context>
chip_gen: v7x
topology: tpu7x:2x2x1
jax: 0.10.0
libtpu: 0.0.40
codegen_flags: <defaults>
</compile_context>

<pallas_src>
import functools

import jax
import jax.numpy as jnp
from jax.experimental import pallas as pl
from jax.experimental.pallas import tpu as pltpu


_INV_SQRT2 = 0.7071067811865476
_MIB = 1024 * 1024


def _round_up(a, m):
    return (a + m - 1) // m * m


def _gelu(h, approximate):
    if approximate:
        # tanh-form GELU -> transcendental goes to the EUP slot (hides under the MXU).
        return jax.nn.gelu(h, approximate=True)
    # exact erf GELU: matches torch.nn.GELU() default semantics.
    return 0.5 * h * (1.0 + jax.lax.erf(h * jnp.float32(_INV_SQRT2)))


# --------------------------------------------------------------------------- kernels
def _ffn_kernel_resident(x_ref, w1_ref, b1_ref, w2_ref, b2_ref, o_ref, *,
                         approximate_gelu):
    # Weights are fully VMEM-resident (constant index_map); one fused step per row tile.
    h = jnp.dot(x_ref[...], w1_ref[...], preferred_element_type=jnp.float32)
    h = h + b1_ref[...].astype(jnp.float32)
    h = _gelu(h, approximate_gelu)
    # TODO(synk): dropout is identity (inference semantics); training-mode dropout
    # would use pltpu.prng_seed / pltpu.prng_random_bits.
    y = jnp.dot(h.astype(w2_ref.dtype), w2_ref[...],
                preferred_element_type=jnp.float32)
    o_ref[...] = (y + b2_ref[...].astype(jnp.float32)).astype(o_ref.dtype)


def _ffn_kernel_stream(x_ref, w1_ref, b1_ref, w2_ref, b2_ref, o_ref, acc_ref, *,
                       approximate_gelu):
    # Streaming mode: ffn dim is a grid reduction axis; accumulate fc2 partials.
    k = pl.program_id(1)

    @pl.when(k == 0)
    def _init():
        acc_ref[...] = jnp.zeros_like(acc_ref)

    h = jnp.dot(x_ref[...], w1_ref[...], preferred_element_type=jnp.float32)
    h = h + b1_ref[...].astype(jnp.float32)
    h = _gelu(h, approximate_gelu)
    # TODO(synk): dropout is identity (inference semantics).
    acc_ref[...] += jnp.dot(h.astype(w2_ref.dtype), w2_ref[...],
                            preferred_element_type=jnp.float32)

    @pl.when(k == pl.num_programs(1) - 1)
    def _finalize():
        o_ref[...] = (acc_ref[...] + b2_ref[...].astype(jnp.float32)
                      ).astype(o_ref.dtype)


# --------------------------------------------------------------------------- config
def _tpu_config():
    """Per-generation tile / VMEM defaults (trace-time, best-effort detection)."""
    try:
        kind = jax.devices()[0].device_kind.lower()
    except Exception:  # pragma: no cover
        kind = ""
    if "v7" in kind:
        # 64 MiB VMEM, 2 TensorCores -> keep >=2 parallel row tiles, modest limit.
        return dict(tm=512, tf=1024, vmem_limit=48 * _MIB, min_row_tiles=2)
    if "v6" in kind:
        # ridge ~650 flop/byte -> big row tiles; 128 MiB VMEM.
        return dict(tm=768, tf=1024, vmem_limit=96 * _MIB, min_row_tiles=1)
    if "v5" in kind or "v4" in kind:
        return dict(tm=512, tf=1024, vmem_limit=96 * _MIB, min_row_tiles=1)
    return dict(tm=512, tf=1024, vmem_limit=48 * _MIB, min_row_tiles=1)


def _vmem_bytes(tm, tf, d_pad, itemsize, streaming):
    """Conservative VMEM working-set estimate (double-buffered inputs/outputs)."""
    w = 2 * (2 * d_pad * tf * itemsize)          # w1 + w2 slices/blocks, x2 buffers
    xio = 2 * (2 * tm * d_pad * itemsize)        # x tile + out tile, x2 buffers
    bias = 2 * (tf + d_pad) * itemsize
    h_tmp = tm * tf * 4                          # compiler-managed f32 hidden temp
    acc = tm * d_pad * 4 if streaming else 0     # f32 accumulator scratch
    return w + xio + bias + h_tmp + acc


# --------------------------------------------------------------------------- wrapper
@functools.partial(jax.jit,
                   static_argnames=("tm", "tf", "approximate_gelu",
                                    "weights_resident"))
def feedforward(x, w1, b1, w2, b2, *, tm=None, tf=None,
                approximate_gelu=False, weights_resident=None):
    """x: [B, S, d_model]; w1: [d_model, ffn_dim]; b1: [ffn_dim];
    w2: [ffn_dim, d_model]; b2: [d_model]. Returns [B, S, d_model]."""
    B, S, d_model = x.shape
    ffn_dim = w1.shape[1]
    N = B * S
    itemsize = jnp.dtype(x.dtype).itemsize
    # dtype-aware sublane tile: 8 for f32, 16 for bf16, 32 for int8/fp8.
    sublane = max(8, 32 // itemsize)

    cfg = _tpu_config()
    tm_target = tm if tm is not None else cfg["tm"]
    tf_target = tf if tf is not None else cfg["tf"]
    vmem_limit = cfg["vmem_limit"]
    budget = vmem_limit - 8 * _MIB          # headroom for Mosaic internal scratch
    min_row_tiles = cfg["min_row_tiles"]

    d_pad = _round_up(d_model, 128)
    f_lane = _round_up(ffn_dim, 128)

    # ---- row tiling (balanced; at least `min_row_tiles` tiles for megacore) ----
    n_tiles = max(pl.cdiv(N, tm_target),
                  min(min_row_tiles, pl.cdiv(N, sublane)))
    tm_eff = _round_up(pl.cdiv(N, n_tiles), sublane)
    n_pad = n_tiles * tm_eff

    # ---- ffn tiling / weight-residency decision ----
    resident = weights_resident
    if resident is None:
        resident = _vmem_bytes(tm_eff, f_lane, d_pad, itemsize,
                               streaming=False) <= budget
    if resident:
        tf_eff = f_lane
        f_pad = f_lane
    else:
        if tf is not None:
            tf_eff = max(128, _round_up(tf, 128))
        else:
            tf_eff = 128
            while (tf_eff * 2 <= min(tf_target, f_lane)
                   and _vmem_bytes(tm_eff, tf_eff * 2, d_pad, itemsize,
                                   streaming=True) <= budget):
                tf_eff *= 2
        # If still over budget, shrink the row tile.
        while (tm_eff > sublane
               and _vmem_bytes(tm_eff, tf_eff, d_pad, itemsize,
                               streaming=True) > budget):
            tm_eff = max(sublane, _round_up(tm_eff // 2, sublane))
            n_tiles = max(pl.cdiv(N, tm_eff),
                          min(min_row_tiles, pl.cdiv(N, sublane)))
            n_pad = n_tiles * tm_eff
        f_pad = _round_up(ffn_dim, tf_eff)
    k_steps = f_pad // tf_eff

    # ---- padding (zero-padding is mathematically neutral: padded ffn lanes give
    # GELU(0)=0 and contribute nothing to fc2; padded rows/lanes are sliced off) ----
    x2 = x.reshape(N, d_model)
    if n_pad != N or d_pad != d_model:
        x2 = jnp.pad(x2, ((0, n_pad - N), (0, d_pad - d_model)))
    # TODO(synk): in a real model, pre-pad the parameters once at load time instead
    # of per call; done per call here only to stay self-contained.
    w1p = w1 if (d_pad == d_model and f_pad == ffn_dim) else jnp.pad(
        w1, ((0, d_pad - d_model), (0, f_pad - ffn_dim)))
    b1p = (b1 if f_pad == ffn_dim else jnp.pad(b1, (0, f_pad - ffn_dim))
           ).reshape(1, f_pad)
    w2p = w2 if (f_pad == ffn_dim and d_pad == d_model) else jnp.pad(
        w2, ((0, f_pad - ffn_dim), (0, d_pad - d_model)))
    b2p = (b2 if d_pad == d_model else jnp.pad(b2, (0, d_pad - d_model))
           ).reshape(1, d_pad)

    if k_steps == 1:
        # Weight-resident fused path: weights DMA'd from HBM exactly once per call.
        kernel = functools.partial(_ffn_kernel_resident,
                                   approximate_gelu=approximate_gelu)
        out = pl.pallas_call(
            kernel,
            out_shape=jax.ShapeDtypeStruct((n_pad, d_pad), x.dtype),
            grid_spec=pltpu.PrefetchScalarGridSpec(
                num_scalar_prefetch=0,
                grid=(n_tiles,),
                in_specs=[
                    pl.BlockSpec((tm_eff, d_pad), lambda i: (i, 0)),   # x row tile
                    pl.BlockSpec((d_pad, f_pad), lambda i: (0, 0)),    # W1 (resident)
                    pl.BlockSpec((1, f_pad), lambda i: (0, 0)),        # b1
                    pl.BlockSpec((f_pad, d_pad), lambda i: (0, 0)),    # W2 (resident)
                    pl.BlockSpec((1, d_pad), lambda i: (0, 0)),        # b2
                ],
                out_specs=pl.BlockSpec((tm_eff, d_pad), lambda i: (i, 0)),
            ),
            compiler_params=pltpu.CompilerParams(
                dimension_semantics=("parallel",),
                vmem_limit_bytes=vmem_limit,
            ),
        )(x2, w1p, b1p, w2p, b2p)
    else:
        # Streaming path: ffn dim reduced across the (arbitrary) k grid axis.
        kernel = functools.partial(_ffn_kernel_stream,
                                   approximate_gelu=approximate_gelu)
        out = pl.pallas_call(
            kernel,
            out_shape=jax.ShapeDtypeStruct((n_pad, d_pad), x.dtype),
            grid_spec=pltpu.PrefetchScalarGridSpec(
                num_scalar_prefetch=0,
                grid=(n_tiles, k_steps),
                in_specs=[
                    pl.BlockSpec((tm_eff, d_pad), lambda i, k: (i, 0)),   # x row tile
                    pl.BlockSpec((d_pad, tf_eff), lambda i, k: (0, k)),   # W1 k-slice
                    pl.BlockSpec((1, tf_eff), lambda i, k: (0, k)),       # b1 k-slice
                    pl.BlockSpec((tf_eff, d_pad), lambda i, k: (k, 0)),   # W2 k-slice
                    pl.BlockSpec((1, d_pad), lambda i, k: (0, 0)),        # b2
                ],
                out_specs=pl.BlockSpec((tm_eff, d_pad), lambda i, k: (i, 0)),
                scratch_shapes=[pltpu.VMEM((tm_eff, d_pad), jnp.float32)],
            ),
            compiler_params=pltpu.CompilerParams(
                dimension_semantics=("parallel", "arbitrary"),
                vmem_limit_bytes=vmem_limit,
            ),
        )(x2, w1p, b1p, w2p, b2p)

    return out[:N, :d_model].reshape(B, S, d_model)


# --------------------------------------------------------------------------- test
def _reference(x, w1, b1, w2, b2):
    hp = jax.lax.Precision.HIGHEST
    h = jnp.einsum("bsd,df->bsf", x, w1, precision=hp) + b1
    h = 0.5 * h * (1.0 + jax.lax.erf(h / jnp.sqrt(2.0)))
    return jnp.einsum("bsf,fd->bsd", h, w2, precision=hp) + b2


def _make_params(key, d_model, ffn_dim):
    # PyTorch nn.Linear stores weight as [out, in]; we keep [in, out] for the kernel.
    k1, kb1, k2, kb2 = jax.random.split(key, 4)
    bound1 = 1.0 / (d_model ** 0.5)
    w1 = jax.random.uniform(k1, (d_model, ffn_dim), jnp.float32, -bound1, bound1)
    b1 = jax.random.uniform(kb1, (ffn_dim,), jnp.float32, -bound1, bound1)
    bound2 = 1.0 / (ffn_dim ** 0.5)
    w2 = jax.random.uniform(k2, (ffn_dim, d_model), jnp.float32, -bound2, bound2)
    b2 = jax.random.uniform(kb2, (d_model,), jnp.float32, -bound2, bound2)
    return w1, b1, w2, b2


if __name__ == "__main__":
    key = jax.random.PRNGKey(0)

    # Case 1: small shapes, auto config -> weight-resident fused path.
    B, S, d_model, ffn_dim = 2, 8, 32, 64
    kx, kp, key = jax.random.split(key, 3)
    x = jax.random.normal(kx, (B, S, d_model), dtype=jnp.float32)
    w1, b1, w2, b2 = _make_params(kp, d_model, ffn_dim)
    out = jax.block_until_ready(feedforward(x, w1, b1, w2, b2))
    ref = _reference(x, w1, b1, w2, b2)
    assert out.shape == (B, S, d_model)
    assert jnp.allclose(out, ref, atol=1e-5, rtol=1e-5), "mismatch (resident path)"

    # Case 2: force the streaming / ffn-reduction path (multi-step k accumulation).
    B, S, d_model, ffn_dim = 2, 8, 128, 512
    kx, kp = jax.random.split(key, 2)
    x = jax.random.normal(kx, (B, S, d_model), dtype=jnp.float32)
    w1, b1, w2, b2 = _make_params(kp, d_model, ffn_dim)
    out = jax.block_until_ready(
        feedforward(x, w1, b1, w2, b2, tf=256, weights_resident=False))
    ref = _reference(x, w1, b1, w2, b2)
    assert out.shape == (B, S, d_model)
    assert jnp.allclose(out, ref, atol=1e-4, rtol=1e-4), "mismatch (streaming path)"

    print("KERNEL_OK")
</pallas_src>

<mosaic_0001>
module attributes {stable_mosaic.version = 11 : i64} {
  func.func @_ffn_kernel_resident(%arg0: i32, %arg1: memref<16x128xf32, #tpu.memory_space<vmem>>, %arg2: memref<128x128xf32, #tpu.memory_space<vmem>>, %arg3: memref<1x128xf32, #tpu.memory_space<vmem>>, %arg4: memref<128x128xf32, #tpu.memory_space<vmem>>, %arg5: memref<1x128xf32, #tpu.memory_space<vmem>>, %arg6: memref<16x128xf32, #tpu.memory_space<vmem>>) attributes {dimension_semantics = [#tpu.dimension_semantics<parallel>], iteration_bounds = array<i64: 1>, scalar_prefetch = 0 : i64, scratch_operands = 0 : i64, tpu.core_type = #tpu.core_type<tc>, window_params = [{transform_indices = @transform_0, window_bounds = array<i64: 16, 128>}, {pipeline_mode = #tpu.pipeline_mode<synchronous>, transform_indices = @transform_1, window_bounds = array<i64: 128, 128>}, {pipeline_mode = #tpu.pipeline_mode<synchronous>, transform_indices = @transform_2, window_bounds = array<i64: 1, 128>}, {pipeline_mode = #tpu.pipeline_mode<synchronous>, transform_indices = @transform_3, window_bounds = array<i64: 128, 128>}, {pipeline_mode = #tpu.pipeline_mode<synchronous>, transform_indices = @transform_4, window_bounds = array<i64: 1, 128>}, {transform_indices = @transform_5, window_bounds = array<i64: 16, 128>}]} {
    %c0 = arith.constant 0 : index
    %c0_0 = arith.constant 0 : index
    %0 = vector.load %arg1[%c0, %c0_0] : memref<16x128xf32, #tpu.memory_space<vmem>>, vector<16x128xf32>
    %c0_1 = arith.constant 0 : index
    %c0_2 = arith.constant 0 : index
    %1 = vector.load %arg2[%c0_1, %c0_2] : memref<128x128xf32, #tpu.memory_space<vmem>>, vector<128x128xf32>
    %cst = arith.constant dense<0.000000e+00> : vector<16x128xf32>
    %2 = tpu.matmul %0, %1, %cst {dimension_numbers = #tpu.dot_dimension_numbers<[1], [0], [0], [1], [0, 0, 1, 1], [], []>} : vector<16x128xf32>, vector<128x128xf32>, vector<16x128xf32> -> vector<16x128xf32>
    %c0_3 = arith.constant 0 : index
    %c0_4 = arith.constant 0 : index
    %3 = vector.load %arg3[%c0_3, %c0_4] : memref<1x128xf32, #tpu.memory_space<vmem>>, vector<1x128xf32>
    %4 = vector.broadcast %3 : vector<1x128xf32> to vector<16x128xf32>
    %5 = arith.addf %2, %4 : vector<16x128xf32>
    %cst_5 = arith.constant 5.000000e-01 : f32
    %6 = vector.broadcast %cst_5 : f32 to vector<16x128xf32>
    %7 = arith.mulf %6, %5 : vector<16x128xf32>
    %cst_6 = arith.constant 0.707106769 : f32
    %8 = vector.broadcast %cst_6 : f32 to vector<16x128xf32>
    %9 = arith.mulf %5, %8 : vector<16x128xf32>
    %10 = math.erf %9 : vector<16x128xf32>
    %cst_7 = arith.constant 1.000000e+00 : f32
    %11 = vector.broadcast %cst_7 : f32 to vector<16x128xf32>
    %12 = arith.addf %11, %10 : vector<16x128xf32>
    %13 = arith.mulf %7, %12 : vector<16x128xf32>
    %c0_8 = arith.constant 0 : index
    %c0_9 = arith.constant 0 : index
    %14 = vector.load %arg4[%c0_8, %c0_9] : memref<128x128xf32, #tpu.memory_space<vmem>>, vector<128x128xf32>
    %cst_10 = arith.constant dense<0.000000e+00> : vector<16x128xf32>
    %15 = tpu.matmul %13, %14, %cst_10 {dimension_numbers = #tpu.dot_dimension_numbers<[1], [0], [0], [1], [0, 0, 1, 1], [], []>} : vector<16x128xf32>, vector<128x128xf32>, vector<16x128xf32> -> vector<16x128xf32>
    %c0_11 = arith.constant 0 : index
    %c0_12 = arith.constant 0 : index
    %16 = vector.load %arg5[%c0_11, %c0_12] : memref<1x128xf32, #tpu.memory_space<vmem>>, vector<1x128xf32>
    %17 = vector.broadcast %16 : vector<1x128xf32> to vector<16x128xf32>
    %18 = arith.addf %15, %17 : vector<16x128xf32>
    %c0_13 = arith.constant 0 : index
    %c0_14 = arith.constant 0 : index
    %19 = vector.load %arg6[%c0_13, %c0_14] : memref<16x128xf32, #tpu.memory_space<vmem>>, vector<16x128xf32>
    tpu.vector_store %arg6[%c0_13, %c0_14], %18 {strides = array<i32>} : memref<16x128xf32, #tpu.memory_space<vmem>>, vector<16x128xf32>,
    return
  }
  func.func @transform_0(%arg0: i32) -> (i32, i32) {
    %c0_i32 = arith.constant 0 : i32
    %c0_i32_0 = arith.constant 0 : i32
    return %arg0, %c0_i32 : i32, i32
  }
  func.func @transform_1(%arg0: i32) -> (i32, i32) {
    %c0_i32 = arith.constant 0 : i32
    %c0_i32_0 = arith.constant 0 : i32
    %c0_i32_1 = arith.constant 0 : i32
    return %c0_i32, %c0_i32_0 : i32, i32
  }
  func.func @transform_2(%arg0: i32) -> (i32, i32) {
    %c0_i32 = arith.constant 0 : i32
    %c0_i32_0 = arith.constant 0 : i32
    %c0_i32_1 = arith.constant 0 : i32
    return %c0_i32, %c0_i32_0 : i32, i32
  }
  func.func @transform_3(%arg0: i32) -> (i32, i32) {
    %c0_i32 = arith.constant 0 : i32
    %c0_i32_0 = arith.constant 0 : i32
    %c0_i32_1 = arith.constant 0 : i32
    return %c0_i32, %c0_i32_0 : i32, i32
  }
  func.func @transform_4(%arg0: i32) -> (i32, i32) {
    %c0_i32 = arith.constant 0 : i32
    %c0_i32_0 = arith.constant 0 : i32
    %c0_i32_1 = arith.constant 0 : i32
    return %c0_i32, %c0_i32_0 : i32, i32
  }
  func.func @transform_5(%arg0: i32) -> (i32, i32) {
    %c0_i32 = arith.constant 0 : i32
    %c0_i32_0 = arith.constant 0 : i32
    return %arg0, %c0_i32 : i32, i32
  }
}

</mosaic_0001>

<bundles_post_ra>
// kernel: feedforward.1
= control target key start
LH: loop header
LB: loop body
LE: loop exit
PB: predicated region body
PF: predicated region fallthrough
CT: control target
= control target key end

     0   :  { %s554_s1 = inlined_call_operand.vmem [shape: f32[128,128], index: 1, kind: input, shape index: {}]   ;;  %s555_s0 = inlined_call_operand.vmem [shape: f32[16,128], index: 0, kind: input, shape index: {}]   ;;  %s556_s3 = inlined_call_operand.vmem [shape: f32[128,128], index: 3, kind: input, shape index: {}]   ;;  %s557_s2 = inlined_call_operand.vmem [shape: f32[1,128], index: 2, kind: input, shape index: {}]   ;;  %s558_s4 = inlined_call_operand.vmem [shape: f32[1,128], index: 4, kind: input, shape index: {}]   ;;  %s559_s5 = inlined_call_operand.vmem [shape: f32[16,128], index: 5, kind: output, shape index: {}]  }
   0x1   :  { %v22_v0 = vld [vmem:[%s554_s1] sm:$0xff]  ;;  %v23_v1 = vld [vmem:[%s554_s1 + $0x8] sm:$0xff]  ;;  %v24_v2 = vld [vmem:[%s554_s1 + $0x10] sm:$0xff] }
   0x2   :  { %v342_v3 = vpack.c.bf16 %v23_v1, %v22_v0  ;;  %v25_v4 = vld [vmem:[%s554_s1 + $0x18] sm:$0xff]  ;;  %v26_v6 = vld [vmem:[%s554_s1 + $0x20] sm:$0xff]  ;;  %v27_v7 = vld [vmem:[%s554_s1 + $0x28] sm:$0xff] }
   0x3   :  { %v346_v5 = vpack.c.bf16 %v25_v4, %v24_v2  ;;  %v350_v8 = vpack.c.bf16 %v27_v7, %v26_v6  ;;  %v28_v9 = vld [vmem:[%s554_s1 + $0x30] sm:$0xff]  ;;  %v29_v10 = vld [vmem:[%s554_s1 + $0x38] sm:$0xff]  ;;  %v20_v11 = vld [vmem:[%s555_s0] sm:$0xff] }
   0x4   :  { %343 = vmatprep.subr.bf16.mxu0 %v342_v3  ;;  %304 = vmatprep.mubr.f32.mxu0 %v20_v11  ;;  %v130_v12 = vld [vmem:[%s556_s3] sm:$0xff]  ;;  %v131_v13 = vld [vmem:[%s556_s3 + $0x8] sm:$0xff]  ;;  %v132_v14 = vld [vmem:[%s556_s3 + $0x10] sm:$0xff]  ;;  %v354_v20 = vpack.c.bf16 %v29_v10, %v28_v9 }
   0x5   :  { %345 = vmatpush3.bf16.msra.mxu0 %v342_v3  ;;  %v374_v15 = vpack.c.bf16 %v131_v13, %v130_v12  ;;  %v133_v16 = vld [vmem:[%s556_s3 + $0x18] sm:$0xff]  ;;  %v134_v18 = vld [vmem:[%s556_s3 + $0x20] sm:$0xff]  ;;  %v135_v19 = vld [vmem:[%s556_s3 + $0x28] sm:$0xff] }
   0x6   :  { %347 = vmatprep.subr.bf16.mxu0 %v346_v5  ;;  %v378_v17 = vpack.c.bf16 %v133_v16, %v132_v14  ;;  %v30_v21 = vld [vmem:[%s554_s1 + $0x40] sm:$0xff]  ;;  %v31_v22 = vld [vmem:[%s554_s1 + $0x48] sm:$0xff]  ;;  %v382_v23 = vpack.c.bf16 %v135_v19, %v134_v18  ;;  %v32_v25 = vld [vmem:[%s554_s1 + $0x50] sm:$0xff] }
   0x7   :  { %375 = vmatprep.subr.bf16.mxu1 %v374_v15  ;;  %v358_v24 = vpack.c.bf16 %v31_v22, %v30_v21  ;;  %v33_v26 = vld [vmem:[%s554_s1 + $0x58] sm:$0xff]  ;;  %v34_v28 = vld [vmem:[%s554_s1 + $0x60] sm:$0xff]  ;;  %v35_v29 = vld [vmem:[%s554_s1 + $0x68] sm:$0xff] }
   0x8   :  { %377 = vmatpush3.bf16.msra.mxu1 %v374_v15  ;;  %v362_v27 = vpack.c.bf16 %v33_v26, %v32_v25  ;;  %v366_v30 = vpack.c.bf16 %v35_v29, %v34_v28  ;;  %v36_v31 = vld [vmem:[%s554_s1 + $0x70] sm:$0xff]  ;;  %v37_v32 = vld [vmem:[%s554_s1 + $0x78] sm:$0xff]  ;;  %v21_v34 = vld [vmem:[%s555_s0 + $0x8] sm:$0xff] }
   0x9   :  { %349 = vmatpush3.bf16.msra.mxu0 %v346_v5  ;;  %379 = vmatprep.subr.bf16.mxu1 %v378_v17  ;;  %v370_v33 = vpack.c.bf16 %v37_v32, %v36_v31  ;;  %v136_v35 = vld [vmem:[%s556_s3 + $0x30] sm:$0xff]  ;;  %v137_v36 = vld [vmem:[%s556_s3 + $0x38] sm:$0xff]  ;;  %v138_v38 = vld [vmem:[%s556_s3 + $0x40] sm:$0xff] }
   0xa   :  { %351 = vmatprep.subr.bf16.mxu0 %v350_v8  ;;  %v386_v37 = vpack.c.bf16 %v137_v36, %v136_v35  ;;  %v139_v39 = vld [vmem:[%s556_s3 + $0x48] sm:$0xff]  ;;  %v140_v41 = vld [vmem:[%s556_s3 + $0x50] sm:$0xff]  ;;  %v141_v42 = vld [vmem:[%s556_s3 + $0x58] sm:$0xff] }
   0xb   :  { %v390_v40 = vpack.c.bf16 %v139_v39, %v138_v38  ;;  %v394_v43 = vpack.c.bf16 %v141_v42, %v140_v41  ;;  %v142_v44 = vld [vmem:[%s556_s3 + $0x60] sm:$0xff]  ;;  %v143_v45 = vld [vmem:[%s556_s3 + $0x68] sm:$0xff]  ;;  %v144_v47 = vld [vmem:[%s556_s3 + $0x70] sm:$0xff] }
   0xc   :  { %381 = vmatpush3.bf16.msra.mxu1 %v378_v17  ;;  %v398_v46 = vpack.c.bf16 %v143_v45, %v142_v44  ;;  %v145_v48 = vld [vmem:[%s556_s3 + $0x78] sm:$0xff]  ;;  %v234_v50 = vld [vmem:[%s557_s2] ss:$0 sm:$0xff] }
   0xd   :  { %353 = vmatpush3.bf16.msra.mxu0 %v350_v8  ;;  %383 = vmatprep.subr.bf16.mxu1 %v382_v23  ;;  %v402_v49 = vpack.c.bf16 %v145_v48, %v144_v47  ;;  %v235_v1 = vld [vmem:[%s558_s4] ss:$0 sm:$0xff] }
   0xe   :  { %355 = vmatprep.subr.bf16.mxu0 %v354_v20 }
  0x10   :  { %385 = vmatpush3.bf16.msra.mxu1 %v382_v23 }
  0x11   :  { %357 = vmatpush3.bf16.msra.mxu0 %v354_v20  ;;  %387 = vmatprep.subr.bf16.mxu1 %v386_v37 }
  0x12   :  { %359 = vmatprep.subr.bf16.mxu0 %v358_v24 }
  0x14   :  { %389 = vmatpush3.bf16.msra.mxu1 %v386_v37 }
  0x15   :  { %361 = vmatpush3.bf16.msra.mxu0 %v358_v24  ;;  %391 = vmatprep.subr.bf16.mxu1 %v390_v40 }
  0x16   :  { %363 = vmatprep.subr.bf16.mxu0 %v362_v27 }
  0x18   :  { %393 = vmatpush3.bf16.msra.mxu1 %v390_v40 }
  0x19   :  { %365 = vmatpush3.bf16.msra.mxu0 %v362_v27  ;;  %395 = vmatprep.subr.bf16.mxu1 %v394_v43 }
  0x1a   :  { %367 = vmatprep.subr.bf16.mxu0 %v366_v30 }
  0x1c   :  { %397 = vmatpush3.bf16.msra.mxu1 %v394_v43 }
  0x1d   :  { %369 = vmatpush3.bf16.msra.mxu0 %v366_v30  ;;  %399 = vmatprep.subr.bf16.mxu1 %v398_v46 }
  0x1e   :  { %371 = vmatprep.subr.bf16.mxu0 %v370_v33 }
  0x20   :  { %401 = vmatpush3.bf16.msra.mxu1 %v398_v46 }
  0x21   :  { %373 = vmatpush3.bf16.msra.mxu0 %v370_v33  ;;  %403 = vmatprep.subr.bf16.mxu1 %v402_v49 }
  0x24   :  { %305 = vmatmul.mubr.f32.vlgmr.msra.gmra.mrb[0].mxu0 %v21_v34  ;;  %405 = vmatpush3.bf16.msra.mxu1 %v402_v49 }
  0xf7   :  { %v306_v51 = vpop.f32.mrb[0].mxu0 }
  0xf8   :  { %v117_v52 = vadd.f32 %v306_v51, %v234_v50  ;;  %v111_v53 = vpop.f32.mrb[1].mxu0 }
  0xf9   :  { %v112_v54 = vadd.f32 %v234_v50, %v111_v53 }
  0xfa   :  { %v123_v55 = vmul.f32 0.70710677, %v117_v52  ;;  %v121_v62 = vmul.f32 0.5, %v117_v52 }
  0xfb   :  { %v122_v56 = vmul.f32 0.70710677, %v112_v54  ;;  %v120_v60 = vmul.f32 0.5, %v112_v54 }
  0xfc   :  { %406 = verf.f32 %v123_v55 }
  0xfd   :  { %408 = verf.f32 %v122_v56 }
 0x106   :  { %v407_v57 = vpop.eup %406 }
 0x107   :  { %v409_v58 = vpop.eup %408  ;;  %v127_v59 = vadd.f32 1.0, %v407_v57 }
 0x108   :  { %v126_v61 = vadd.f32 1.0, %v409_v58 }
 0x109   :  { %v129_v0 = vmul.f32 %v127_v59, %v121_v62 }
 0x10a   :  { %v128_v63 = vmul.f32 %v126_v61, %v120_v60 }
 0x10c   :  { %339 = vmatprep.mubr.f32.mxu1 %v128_v63 }
 0x10d   :  { %340 = vmatmul.mubr.f32.vlgmr.msra.gmra.mrb[0].mxu1 %v129_v0 }
 0x1e0   :  { %v341_v2 = vpop.f32.mrb[0].mxu1 }
 0x1e1   :  { %v225_v3 = vadd.f32 %v341_v2, %v235_v1  ;;  %v219_v4 = vpop.f32.mrb[1].mxu1 }
 0x1e2   :  { %v220_v5 = vadd.f32 %v235_v1, %v219_v4 }
 0x1e3   :  { %229 = vst [vmem:[%s559_s5 + $0x8] sm:$0xff] %v225_v3 }
 0x1e4   :  { %228 = vst [vmem:[%s559_s5] sm:$0xff] %v220_v5 }

</bundles_post_ra>
